<compile_context>
chip_gen: v6e
topology: v6e:2x2x1
jax: 0.10.0
libtpu: 0.0.40
codegen_flags: <defaults>
</compile_context>

<pallas_src>
import functools

import jax
import jax.numpy as jnp
from jax.experimental import pallas as pl
from jax.experimental.pallas import tpu as pltpu

_LANE = 128


def _nice_kernel(alpha,
                 zT_ref, sT_ref, w1aT_ref, w1bT_ref, b1T_ref,
                 w2T_ref, b2T_ref, w3T_ref, b3T_ref, oT_ref):
    """Batch-on-lanes NICE coupling step.

    zT_ref: (Z, TM) batch tile, batch on the lane axis.  All weights/biases are
    pre-transposed and zero-padded in the wrapper, so the body is full-ref
    (no sub-(8,128) slicing) and the output is one lane-dense full-tile store.
    """
    zT = zT_ref[...]                                          # (Z, TM) f32

    # NNRegNICE: cat([x, x^2]) @ W1 == z @ W1a_pad + (z*z) @ W1b_pad
    # (W1 split + zero-padded along K in the wrapper; zero K-rows are free on
    #  the MXU since K is padded to 128 anyway.)
    h = (jnp.dot(w1aT_ref[...], zT, preferred_element_type=jnp.float32)
         + jnp.dot(w1bT_ref[...], zT * zT, preferred_element_type=jnp.float32)
         + b1T_ref[...])                                      # (4*nin, TM)
    h = jnp.where(h > 0, h, alpha * h)                        # LeakyReLU(alpha)

    h = jnp.tanh(jnp.dot(w2T_ref[...], h, preferred_element_type=jnp.float32)
                 + b2T_ref[...])                              # (2*nin, TM)

    # W3/b3 zero-padded to full Z: t sits on the coupled slice, 0 on the frozen
    # slice -> additive coupling + scaling by s is a single unmasked store.
    t = (jnp.dot(w3T_ref[...], h, preferred_element_type=jnp.float32)
         + b3T_ref[...])                                      # (Z, TM)
    oT_ref[...] = ((zT + t) * sT_ref[...]).astype(oT_ref.dtype)


def _pick_batch_tile(B, Z, per_tile_extra_bytes, *, itemsize=4,
                     target_bytes=1 << 20, budget_bytes=12 * 1024 * 1024):
    """Lane-axis batch tile: ~1 MiB of z per grid step, >=2 (ideally 4) steps,
    multiple of 128 lanes, capped by a conservative cross-generation VMEM budget."""
    if B <= 2 * _LANE:
        return B                                   # too small to split on lanes
    target = max(_LANE, ((target_bytes // (itemsize * Z)) // _LANE) * _LANE)
    steps = 4 if B >= 4 * _LANE else 2
    cap = max(_LANE, ((B // steps) // _LANE) * _LANE)
    tm = min(target, cap)

    def vmem_estimate(t):
        stream = 2 * 2 * itemsize * Z * t          # double-buffered zT in + oT out
        acts = 2 * itemsize * t * per_tile_extra_bytes  # h1/h2/t temporaries (+slack)
        return stream + acts

    while tm > _LANE and vmem_estimate(tm) > budget_bytes:
        tm = max(_LANE, ((tm // 2) // _LANE) * _LANE)
    return tm


def nice_forward(z, params, *, d, order="first", alpha=0.2):
    """z: (B, Z) f32. Returns (z_transformed (B, Z), log_det scalar)."""
    B, Z = z.shape
    nin = d if order == "first" else Z - d
    h1, h2 = 4 * nin, 2 * nin

    s = params["s"]                                # (1, Z)
    w1, b1 = params["w1"], params["b1"]            # (2*nin, 4*nin), (1, 4*nin)
    w2, b2 = params["w2"], params["b2"]            # (4*nin, 2*nin), (1, 2*nin)
    w3, b3 = params["w3"], params["b3"]            # (2*nin, nout),  (1, nout)

    if order == "first":
        in_lo, in_hi = 0, d                        # nn input slice of z
        add_lo, add_hi = d, Z                      # coupled (t-added) slice
    else:
        in_lo, in_hi = d, Z
        add_lo, add_hi = 0, d

    # --- wrapper-side weight prep (tiny; removes all in-kernel slicing) ---
    # W1 split into x / x^2 halves, zero-padded along K to full Z so the kernel
    # contracts against the whole z tile.
    w1a = jnp.zeros((Z, h1), jnp.float32).at[in_lo:in_hi].set(w1[:nin])
    w1b = jnp.zeros((Z, h1), jnp.float32).at[in_lo:in_hi].set(w1[nin:])
    # W3/b3 zero-padded along the output dim to full Z (t on the coupled slice).
    w3p = jnp.zeros((h2, Z), jnp.float32).at[:, add_lo:add_hi].set(w3)
    b3p = jnp.zeros((1, Z), jnp.float32).at[:, add_lo:add_hi].set(b3)

    # Batch-on-lanes layout: transpose everything so batch maps to the lane axis.
    zT = z.T                                       # (Z, B)
    w1aT, w1bT = w1a.T, w1b.T                      # (h1, Z)
    w2T, w3pT = w2.T, w3p.T                        # (h2, h1), (Z, h2)
    b1T, b2T, b3pT = b1.T, b2.T, b3p.T             # (h1,1), (h2,1), (Z,1)
    sT = s.T                                       # (Z, 1)

    per_tile_extra = 4 * (h1 + h2 + 2 * Z)         # bytes/row of activation temps
    tm = _pick_batch_tile(B, Z, per_tile_extra)
    grid = (pl.cdiv(B, tm),)

    resident_bytes = 2 * 4 * sum(int(a.size) for a in
                                 (w1aT, w1bT, b1T, w2T, b2T, w3pT, b3pT, sT))
    est = 2 * 2 * 4 * Z * tm + 2 * 4 * tm * (h1 + h2 + 2 * Z) + resident_bytes
    # Explicit scoped-VMEM budget: above v5e's 16 MiB default, within v7x's 64 MiB.
    vmem_limit = int(min(48 * 1024 * 1024, max(32 * 1024 * 1024, 2 * est)))

    kernel = functools.partial(_nice_kernel, float(alpha))

    z_spec = pl.BlockSpec((Z, tm), lambda i: (0, i))        # streams over batch
    out_spec = pl.BlockSpec((Z, tm), lambda i: (0, i))
    resident = lambda a: pl.BlockSpec(a.shape, lambda i: (0, 0))  # VMEM-resident

    flops = B * (4 * h1 * Z + 2 * h2 * h1 + 2 * Z * h2 + 6 * Z)
    transcendentals = B * h2
    bytes_accessed = 4 * 2 * B * Z + resident_bytes // 2

    outT = pl.pallas_call(
        kernel,
        out_shape=jax.ShapeDtypeStruct((Z, B), jnp.float32),
        grid=grid,
        in_specs=[z_spec,
                  resident(sT), resident(w1aT), resident(w1bT), resident(b1T),
                  resident(w2T), resident(b2T), resident(w3pT), resident(b3pT)],
        out_specs=out_spec,
        compiler_params=pltpu.CompilerParams(
            dimension_semantics=("parallel",),
            vmem_limit_bytes=vmem_limit),
        cost_estimate=pl.CostEstimate(
            flops=int(flops),
            transcendentals=int(transcendentals),
            bytes_accessed=int(bytes_accessed)),
    )(zT, sT, w1aT, w1bT, b1T, w2T, b2T, w3pT, b3pT)

    # log_det = sum(log(s)) -- trivial scalar reduction, done in the wrapper.
    # (Matches the PyTorch module; NaNs if any s <= 0 -- init keeps s > 0.)
    log_det = jnp.sum(jnp.log(s))
    return outT.T, log_det


def init_params(key, z_dim, d, order="first"):
    """Deterministic synthetic init (PyTorch-like uniform fan-in scaling)."""
    nin = d if order == "first" else z_dim - d
    nout = z_dim - nin
    dims = [
        (2 * nin, 4 * nin),   # Dense1
        (4 * nin, 2 * nin),   # Dense2
        (2 * nin, nout),      # Dense3
    ]
    params = {}
    for i, (fan_in, fan_out) in enumerate(dims, start=1):
        key, kw, kb = jax.random.split(key, 3)
        bound = 1.0 / jnp.sqrt(jnp.float32(fan_in))
        # stored already transposed: (in, out)
        params[f"w{i}"] = jax.random.uniform(
            kw, (fan_in, fan_out), jnp.float32, -bound, bound)
        params[f"b{i}"] = jax.random.uniform(
            kb, (1, fan_out), jnp.float32, -bound, bound)
    # s is nn.Parameter(torch.ones(Z)); use positive nontrivial values here.
    key, ks = jax.random.split(key)
    params["s"] = jax.random.uniform(ks, (1, z_dim), jnp.float32, 0.5, 1.5)
    return params


def reference_forward(z, params, *, d, order="first", alpha=0.2):
    x = z[:, :d] if order == "first" else z[:, d:]
    h = jnp.concatenate([x, x * x], axis=1)
    h = h @ params["w1"] + params["b1"]
    h = jnp.where(h > 0, h, alpha * h)
    h = jnp.tanh(h @ params["w2"] + params["b2"])
    t = h @ params["w3"] + params["b3"]
    if order == "first":
        z_ = jnp.concatenate([z[:, :d], z[:, d:] + t], axis=1)
    else:
        z_ = jnp.concatenate([z[:, :d] + t, z[:, d:]], axis=1)
    z_ = z_ * params["s"]
    return z_, jnp.sum(jnp.log(params["s"]))


if __name__ == "__main__":
    Z, d, B = 8, 3, 512        # B=512 -> tm=128 -> 4 grid steps (pipelined, 2-TC)
    alpha = 0.2

    key = jax.random.PRNGKey(0)
    key, kz = jax.random.split(key)
    z = jax.random.normal(kz, (B, Z), jnp.float32)

    for idx, order in enumerate(("first", "last")):
        params = init_params(jax.random.fold_in(key, idx), Z, d, order=order)
        out, log_det = nice_forward(z, params, d=d, order=order, alpha=alpha)
        out = jax.block_until_ready(out)

        ref_out, ref_log_det = reference_forward(z, params, d=d, order=order,
                                                 alpha=alpha)
        assert out.shape == (B, Z)
        assert jnp.allclose(out, ref_out, atol=1e-5, rtol=1e-5), \
            f"mismatch vs reference (order={order})"
        assert jnp.allclose(log_det, ref_log_det, atol=1e-6, rtol=1e-6), \
            f"log_det mismatch (order={order})"

    print("KERNEL_OK")
</pallas_src>

<mosaic_0001>
module attributes {stable_mosaic.version = 11 : i64} {
  func.func @_nice_kernel(%arg0: i32, %arg1: memref<8x128xf32, #tpu.memory_space<vmem>>, %arg2: memref<8x1xf32, #tpu.memory_space<vmem>>, %arg3: memref<12x8xf32, #tpu.memory_space<vmem>>, %arg4: memref<12x8xf32, #tpu.memory_space<vmem>>, %arg5: memref<12x1xf32, #tpu.memory_space<vmem>>, %arg6: memref<6x12xf32, #tpu.memory_space<vmem>>, %arg7: memref<6x1xf32, #tpu.memory_space<vmem>>, %arg8: memref<8x6xf32, #tpu.memory_space<vmem>>, %arg9: memref<8x1xf32, #tpu.memory_space<vmem>>, %arg10: memref<8x128xf32, #tpu.memory_space<vmem>>) attributes {dimension_semantics = [#tpu.dimension_semantics<parallel>], iteration_bounds = array<i64: 4>, scalar_prefetch = 0 : i64, scratch_operands = 0 : i64, tpu.core_type = #tpu.core_type<tc>, window_params = [{transform_indices = @transform_0, window_bounds = array<i64: 8, 128>}, {pipeline_mode = #tpu.pipeline_mode<synchronous>, transform_indices = @transform_1, window_bounds = array<i64: 8, 1>}, {pipeline_mode = #tpu.pipeline_mode<synchronous>, transform_indices = @transform_2, window_bounds = array<i64: 12, 8>}, {pipeline_mode = #tpu.pipeline_mode<synchronous>, transform_indices = @transform_3, window_bounds = array<i64: 12, 8>}, {pipeline_mode = #tpu.pipeline_mode<synchronous>, transform_indices = @transform_4, window_bounds = array<i64: 12, 1>}, {pipeline_mode = #tpu.pipeline_mode<synchronous>, transform_indices = @transform_5, window_bounds = array<i64: 6, 12>}, {pipeline_mode = #tpu.pipeline_mode<synchronous>, transform_indices = @transform_6, window_bounds = array<i64: 6, 1>}, {pipeline_mode = #tpu.pipeline_mode<synchronous>, transform_indices = @transform_7, window_bounds = array<i64: 8, 6>}, {pipeline_mode = #tpu.pipeline_mode<synchronous>, transform_indices = @transform_8, window_bounds = array<i64: 8, 1>}, {transform_indices = @transform_9, window_bounds = array<i64: 8, 128>}]} {
    %c0 = arith.constant 0 : index
    %c0_0 = arith.constant 0 : index
    %0 = vector.load %arg1[%c0, %c0_0] : memref<8x128xf32, #tpu.memory_space<vmem>>, vector<8x128xf32>
    %c0_1 = arith.constant 0 : index
    %c0_2 = arith.constant 0 : index
    %1 = vector.load %arg3[%c0_1, %c0_2] : memref<12x8xf32, #tpu.memory_space<vmem>>, vector<12x8xf32>
    %cst = arith.constant dense<0.000000e+00> : vector<12x128xf32>
    %2 = tpu.matmul %1, %0, %cst {dimension_numbers = #tpu.dot_dimension_numbers<[1], [0], [0], [1], [0, 0, 1, 1], [], []>} : vector<12x8xf32>, vector<8x128xf32>, vector<12x128xf32> -> vector<12x128xf32>
    %c0_3 = arith.constant 0 : index
    %c0_4 = arith.constant 0 : index
    %3 = vector.load %arg4[%c0_3, %c0_4] : memref<12x8xf32, #tpu.memory_space<vmem>>, vector<12x8xf32>
    %4 = arith.mulf %0, %0 : vector<8x128xf32>
    %cst_5 = arith.constant dense<0.000000e+00> : vector<12x128xf32>
    %5 = tpu.matmul %3, %4, %cst_5 {dimension_numbers = #tpu.dot_dimension_numbers<[1], [0], [0], [1], [0, 0, 1, 1], [], []>} : vector<12x8xf32>, vector<8x128xf32>, vector<12x128xf32> -> vector<12x128xf32>
    %6 = arith.addf %2, %5 : vector<12x128xf32>
    %c0_6 = arith.constant 0 : index
    %c0_7 = arith.constant 0 : index
    %7 = vector.load %arg5[%c0_6, %c0_7] : memref<12x1xf32, #tpu.memory_space<vmem>>, vector<12x1xf32>
    %8 = vector.broadcast %7 : vector<12x1xf32> to vector<12x128xf32>
    %9 = arith.addf %6, %8 : vector<12x128xf32>
    %cst_8 = arith.constant 0.000000e+00 : f32
    %10 = vector.broadcast %cst_8 : f32 to vector<12x128xf32>
    %11 = arith.cmpf ogt, %9, %10 : vector<12x128xf32>
    %cst_9 = arith.constant 2.000000e-01 : f32
    %12 = vector.broadcast %cst_9 : f32 to vector<12x128xf32>
    %13 = arith.mulf %12, %9 : vector<12x128xf32>
    %14 = arith.select %11, %9, %13 : vector<12x128xi1>, vector<12x128xf32>
    %c0_10 = arith.constant 0 : index
    %c0_11 = arith.constant 0 : index
    %15 = vector.load %arg6[%c0_10, %c0_11] : memref<6x12xf32, #tpu.memory_space<vmem>>, vector<6x12xf32>
    %cst_12 = arith.constant dense<0.000000e+00> : vector<6x128xf32>
    %16 = tpu.matmul %15, %14, %cst_12 {dimension_numbers = #tpu.dot_dimension_numbers<[1], [0], [0], [1], [0, 0, 1, 1], [], []>} : vector<6x12xf32>, vector<12x128xf32>, vector<6x128xf32> -> vector<6x128xf32>
    %c0_13 = arith.constant 0 : index
    %c0_14 = arith.constant 0 : index
    %17 = vector.load %arg7[%c0_13, %c0_14] : memref<6x1xf32, #tpu.memory_space<vmem>>, vector<6x1xf32>
    %18 = vector.broadcast %17 : vector<6x1xf32> to vector<6x128xf32>
    %19 = arith.addf %16, %18 : vector<6x128xf32>
    %20 = math.tanh %19 : vector<6x128xf32>
    %c0_15 = arith.constant 0 : index
    %c0_16 = arith.constant 0 : index
    %21 = vector.load %arg8[%c0_15, %c0_16] : memref<8x6xf32, #tpu.memory_space<vmem>>, vector<8x6xf32>
    %cst_17 = arith.constant dense<0.000000e+00> : vector<8x128xf32>
    %22 = tpu.matmul %21, %20, %cst_17 {dimension_numbers = #tpu.dot_dimension_numbers<[1], [0], [0], [1], [0, 0, 1, 1], [], []>} : vector<8x6xf32>, vector<6x128xf32>, vector<8x128xf32> -> vector<8x128xf32>
    %c0_18 = arith.constant 0 : index
    %c0_19 = arith.constant 0 : index
    %23 = vector.load %arg9[%c0_18, %c0_19] : memref<8x1xf32, #tpu.memory_space<vmem>>, vector<8x1xf32>
    %24 = vector.broadcast %23 : vector<8x1xf32> to vector<8x128xf32>
    %25 = arith.addf %22, %24 : vector<8x128xf32>
    %26 = arith.addf %0, %25 : vector<8x128xf32>
    %c0_20 = arith.constant 0 : index
    %c0_21 = arith.constant 0 : index
    %27 = vector.load %arg2[%c0_20, %c0_21] : memref<8x1xf32, #tpu.memory_space<vmem>>, vector<8x1xf32>
    %28 = vector.broadcast %27 : vector<8x1xf32> to vector<8x128xf32>
    %29 = arith.mulf %26, %28 : vector<8x128xf32>
    %c0_22 = arith.constant 0 : index
    %c0_23 = arith.constant 0 : index
    %30 = vector.load %arg10[%c0_22, %c0_23] : memref<8x128xf32, #tpu.memory_space<vmem>>, vector<8x128xf32>
    tpu.vector_store %arg10[%c0_22, %c0_23], %29 {strides = array<i32>} : memref<8x128xf32, #tpu.memory_space<vmem>>, vector<8x128xf32>,
    return
  }
  func.func @transform_0(%arg0: i32) -> (i32, i32) {
    %c0_i32 = arith.constant 0 : i32
    %c0_i32_0 = arith.constant 0 : i32
    return %c0_i32, %arg0 : i32, i32
  }
  func.func @transform_1(%arg0: i32) -> (i32, i32) {
    %c0_i32 = arith.constant 0 : i32
    %c0_i32_0 = arith.constant 0 : i32
    %c0_i32_1 = arith.constant 0 : i32
    return %c0_i32, %c0_i32_0 : i32, i32
  }
  func.func @transform_2(%arg0: i32) -> (i32, i32) {
    %c0_i32 = arith.constant 0 : i32
    %c0_i32_0 = arith.constant 0 : i32
    %c0_i32_1 = arith.constant 0 : i32
    return %c0_i32, %c0_i32_0 : i32, i32
  }
  func.func @transform_3(%arg0: i32) -> (i32, i32) {
    %c0_i32 = arith.constant 0 : i32
    %c0_i32_0 = arith.constant 0 : i32
    %c0_i32_1 = arith.constant 0 : i32
    return %c0_i32, %c0_i32_0 : i32, i32
  }
  func.func @transform_4(%arg0: i32) -> (i32, i32) {
    %c0_i32 = arith.constant 0 : i32
    %c0_i32_0 = arith.constant 0 : i32
    %c0_i32_1 = arith.constant 0 : i32
    return %c0_i32, %c0_i32_0 : i32, i32
  }
  func.func @transform_5(%arg0: i32) -> (i32, i32) {
    %c0_i32 = arith.constant 0 : i32
    %c0_i32_0 = arith.constant 0 : i32
    %c0_i32_1 = arith.constant 0 : i32
    return %c0_i32, %c0_i32_0 : i32, i32
  }
  func.func @transform_6(%arg0: i32) -> (i32, i32) {
    %c0_i32 = arith.constant 0 : i32
    %c0_i32_0 = arith.constant 0 : i32
    %c0_i32_1 = arith.constant 0 : i32
    return %c0_i32, %c0_i32_0 : i32, i32
  }
  func.func @transform_7(%arg0: i32) -> (i32, i32) {
    %c0_i32 = arith.constant 0 : i32
    %c0_i32_0 = arith.constant 0 : i32
    %c0_i32_1 = arith.constant 0 : i32
    return %c0_i32, %c0_i32_0 : i32, i32
  }
  func.func @transform_8(%arg0: i32) -> (i32, i32) {
    %c0_i32 = arith.constant 0 : i32
    %c0_i32_0 = arith.constant 0 : i32
    %c0_i32_1 = arith.constant 0 : i32
    return %c0_i32, %c0_i32_0 : i32, i32
  }
  func.func @transform_9(%arg0: i32) -> (i32, i32) {
    %c0_i32 = arith.constant 0 : i32
    %c0_i32_0 = arith.constant 0 : i32
    return %c0_i32, %arg0 : i32, i32
  }
}

</mosaic_0001>

<bundles_post_ra>
// kernel: tpu_custom_call.1
= control target key start
LH: loop header
LB: loop body
LE: loop exit
PB: predicated region body
PF: predicated region fallthrough
CT: control target
= control target key end

     0   :  { %14 = vsyncpa [#allocation3], 0  ;;  %s1114_s0 = inlined_call_operand.vmem [shape: f32[8,512], index: 0, kind: input, shape index: {}]   ;;  %s1115_s1 = inlined_call_operand.vmem [shape: f32[8,1], index: 1, kind: input, shape index: {}]   ;;  %s1116_s2 = inlined_call_operand.vmem [shape: f32[12,8], index: 2, kind: input, shape index: {}]   ;;  %s1117_s3 = inlined_call_operand.vmem [shape: f32[12,8], index: 3, kind: input, shape index: {}]   ;;  %s1118_s4 = inlined_call_operand.vmem [shape: f32[12,1], index: 4, kind: input, shape index: {}]   ;;  %s1119_s5 = inlined_call_operand.vmem [shape: f32[6,12], index: 5, kind: input, shape index: {}]   ;;  %s1120_s6 = inlined_call_operand.vmem [shape: f32[6,1], index: 6, kind: input, shape index: {}]   ;;  %s1121_s7 = inlined_call_operand.vmem [shape: f32[8,6], index: 7, kind: input, shape index: {}]   ;;  %s1122_s8 = inlined_call_operand.vmem [shape: f32[8,1], index: 8, kind: input, shape index: {}]   ;;  %s1123_s9 = inlined_call_operand.hbm [shape: f32[8,512], index: 9, kind: output, shape index: {}]  }
   0x1   :  { %16 = vsyncpa [#allocation3 + $0x1], 0  ;;  %s983_s30 = smov 0   ;;  %s985_s10 = smov 0  }
   0x2   :  { %s987_s11 = smov 0   ;;  %s989_s12 = smov 0  }
   0x3 LB: > { %s1004_s13 = sadd.s32 4294967295, %s927_s12   ;;  %s770_s14 = sadd.s32 4294967294, %s927_s12   ;;  %s927_s12 = sphi %s989_s12, %s1129_s12   ;;  %s923_s11 = sphi %s987_s11, %s1128_s11   ;;  %s919_s10 = sphi %s985_s10, %s1127_s10   ;;  %s915_s30 = sphi %s983_s30, %s1126_s30  }
   0x4   : > { %s1008_s15 = sadd.s32 1, %s927_s12   ;;  %s223_s16 = sadd.s32 1, %s923_s11 }
   0x5   : > { %s220_s17 = ssub.s32 %s927_s12, %s1008_s15  ;;  %p233_p0 = scmp.ne.s32.totalorder %s923_s11, %s919_s10 }
   0x6   : > { %p221_p1 = scmp.eq.s32.totalorder %s220_s17, 0  ;;  %p234_p2 = scmp.eq.s32.totalorder %s1004_s13, 3 }
   0x7   : > { %p239_p3 = scmp.ne.s32.totalorder %s919_s10, %s915_s30  ;;  %p240_p4 = scmp.eq.s32.totalorder %s770_s14, 3 }
   0x8   : > { %s1019_s18 = scalar_select %p221_p1, %s923_s11, %s223_s16  }
   0x9   : > { %p1021_p5 = por %p234_p2, %p233_p0  ;;  %p1025_p6 = por %p240_p4, %p239_p3 }
   0xa   : > { %p773_p7 = scmp.ge.s32.totalorder %s927_s12, 1  ;;  %p289_p8 = scmp.lt.s32.totalorder %s927_s12, 5 }
   0xc   : > { %p290_p9 = pnand %p773_p7, %p289_p8 }
   0xd   : > { %p324_p10 = scmp.lt.s32.totalorder (!%p290_p9), %s1004_s13, 3  ;;  %s321_s24 = sand.u32 (!%p290_p9), 1, %s919_s10  }
   0xe   : > { %293 = sbr.rel (%p290_p9) target bundleno = 653 (0x28d), region = 56  ;;  %s774_s25 = sshll.u32 (!%p290_p9), %s321_s24, 3 }
   0xf   : > { %s785_s26 = sshll.u32 (!%p290_p9), %s1004_s13, 7  ;;  %s698_s17 = scalar_lea.sflag (!%p290_p9), [#allocation3], %s321_s24 }
  0x10   : > { %s709_s16 = scalar_lea.hbm (!%p290_p9), %s1123_s9, %s785_s26  ;;  %s932_s22 = smov (!%p290_p9), [#allocation2]  }
  0x13   : > { %v329_v0 = vld [vmem:[%s1116_s2] sm:$0xff]  ;;  %vm334_vm0 = vcmask 64512   ;;  %v498_v2 = vld [vmem:[%s1118_s4 + $0x8] sm:$0xf]  ;;  %s325_s27 = scalar_select %p324_p10, %s1004_s13, 3  ;;  %v929_v3 = vmov 0  }
  0x14   : > { %v331_v1 = vld [vmem:[%s1117_s3] sm:$0xff]  ;;  %806 = vmatprep.mubr.msk.f32.mxu1 %vm334_vm0, %v329_v0  ;;  %863 = vset.pattern.permute.xlu0 %v929_v3  ;;  %v330_v6 = vld [vmem:[%s1116_s2 + $0x8] sm:$0xf]  ;;  %v930_v10 = vmov 0.0   ;;  %vm931_vm1 = vmmov 0   ;;  %vm528_vm3 = vcmask 1043456  }
  0x15   : > { %801 = vmatprep.mubr.msk.f32.mxu0 %vm334_vm0, %v331_v1  ;;  %864 = vset.pattern.permute.xlu1 %v929_v3  ;;  %s775_s28 = sshll.u32 %s325_s27, 3  ;;  %v497_v4 = vld [vmem:[%s1118_s4] sm:$0xff]  ;;  %v332_v8 = vld [vmem:[%s1117_s3 + $0x8] sm:$0xf]  ;;  %vm524_vm5 = vcmask 97280   ;;  %vm614_vm6 = vcmask 1045504  }
  0x16   : > { %506 = vperm.xlu0 %863, %v498_v2   ;;  %s327_s21 = scalar_lea.vmem %s1114_s0, %s775_s28  ;;  %v689_v9 = vld [vmem:[%s1115_s1] sm:$0xff]  ;;  %vm610_vm7 = vcmask 48128   ;;  %s323_s27 = scalar_lea.vmem [#allocation2], %s774_s25 }
  0x17   : > { %v1050_v5 = vld [vmem:[%s327_s21] sm:$0xff]  ;;  %s711_s28 = sshll.u32 %s323_s27, 4  ;;  %s871_s13 = sshll.u32 %s932_s22, 4  ;;  %s712_s28 = int_to_ptr.vmem [resolvable:$true] %s711_s28  ;;  %s872_s13 = int_to_ptr.vmem [resolvable:$false] %s871_s13 }
  0x18   : > { %804 = vmatprep.subr.mxu1 %v1050_v5  ;;  %v333_v7 = vmul.f32 %v1050_v5, %v1050_v5  ;;  %v518_v11 = vld [vmem:[%s1120_s6] sm:$0x3f]  ;;  %s867_s21 = scalar_lea.vmem %s712_s28, 128  ;;  %s873_s23 = scalar_lea.vmem %s872_s13, 256 }
  0x19   : > { %805 = vmatpush3.msra.mxu1 %v1050_v5  ;;  %521 = vperm.xlu1 %864, %v518_v11   ;;  %v604_v12 = vld [vmem:[%s1122_s8] sm:$0xff]  ;;  %p868_p11 = scmp.ne.s32.totalorder %s712_s28, %s867_s21  ;;  %p874_p0 = scmp.lt.s32.totalorder %s712_s28, %s872_s13 }
  0x1a   : > { %501 = vperm.xlu0 %863, %v497_v4   ;;  %799 = vmatprep.subr.mxu0 %v333_v7  ;;  %v517_v26 = vld [vmem:[%s1119_s5] sm:$0x3f]  ;;  %p875_p1 = scmp.lt.s32.totalorder %s873_s23, %s867_s21 }
  0x1b   : > { %807 = vmatmul.mubr.msk.f32.vlgmr.msra.gmra.mxu1 %vm334_vm0, %v330_v6  ;;  %800 = vmatpush3.msra.mxu0 %v333_v7  ;;  %v603_v32 = vld [vmem:[%s1121_s7] sm:$0xff]  ;;  %p869_p12 = pnand %p868_p11, %p1021_p5 }
  0x1c   : > { %802 = vmatmul.mubr.msk.f32.vlgmr.msra.gmra.mxu0 %vm334_vm0, %v332_v8  ;;  %809 = vmatprep.subr.mxu0 %v930_v10  ;;  %p876_p2 = por %p875_p1, %p874_p0 }
  0x1d   : > { %816 = vmatprep.subr.mxu1 %v930_v10  ;;  %813 = vmatprep.mubr.msk.f32.mxu0 %vm931_vm1, %v930_v10  ;;  %p870_p13 = pneg %p869_p12 }
  0x1e   : > { %692 = vperm.xlu0 %863, %v689_v9   ;;  %818 = vmatprep.mubr.msk.f32.mxu1 %vm931_vm1, %v930_v10 }
  0x1f   : > { %607 = vperm.xlu1 %864, %v604_v12   ;;  %p877_p3 = pnand %p876_p2, %p870_p13 }
  0x91   : > { %v507_v13 = vpop.permute.xlu0 %506 }
  0x94   : > { %v522_v28 = vpop.permute.xlu1 %521 }
  0x95   : > { %v502_v21 = vpop.permute.xlu0 %501 }
  0x99   : > { %v693_v39 = vpop.permute.xlu0 %692 }
  0x9a   : > { %v608_v34 = vpop.permute.xlu1 %607 }
  0xdb   : > { %v808_v14 = vpop.f32.mrf.mxu1 }
  0xdc   : > { %v803_v15 = vpop.f32.mrf.mxu0 }
  0xdd   : > { %v494_v16 = vadd.f32 %v808_v14, %v803_v15  ;;  %v488_v17 = vpop.f32.mrf.mxu1 }
  0xde   : > { %v407_v18 = vpop.f32.mrf.mxu0 }
  0xdf   : > { %v510_v19 = vadd.f32 %v507_v13, %v494_v16  ;;  %v489_v20 = vadd.f32 %v488_v17, %v407_v18 }
  0xe1   : > { %vm512_vm2 = vcmp.gt.f32.partialorder %v510_v19, 0.0  ;;  %v514_v22 = vmul.f32 0.2, %v510_v19  ;;  %v509_v23 = vadd.f32 %v502_v21, %v489_v20 }
  0xe3   : > { %v513_v24 = vmul.f32 0.2, %v509_v23  ;;  %v516_v25 = vsel %vm512_vm2, %v510_v19, %v514_v22  ;;  %vm511_vm4 = vcmp.gt.f32.partialorder %v509_v23, 0.0 }
  0xe4   : > { %810 = vmatpush3.msk.msra.mxu0 %vm528_vm3, %v516_v25 }
  0xe5   : > { %811 = vmatprep.subr.mxu0 %v930_v10  ;;  %v515_v27 = vsel %vm511_vm4, %v509_v23, %v513_v24 }
  0xe6   : > { %812 = vmatpush3.msra.mxu0 %v515_v27 }
  0xe7   : > { %814 = vmatmul.mubr.msk.f32.vlgmr.msra.gmra.mxu0 %vm524_vm5, %v517_v26 }
 0x1a7   : > { %v598_v29 = vpop.f32.mrf.mxu0 }
 0x1a8   : > { %v599_v30 = vadd.f32 %v598_v29, %v522_v28 }
 0x1a9   : > { %v815_v31 = vpop.f32.mrf.mxu0 }
 0x1aa   : > { %865 = vtanh.f32 %v599_v30 }
 0x1b7   : > { %v866_v33 = vpop.eup %865 }
 0x1b8   : > { %817 = vmatpush3.msk.msra.mxu1 %vm614_vm6, %v866_v33 }
 0x1b9   : > { %819 = vmatmul.mubr.msk.f32.vlgmr.msra.gmra.mxu1 %vm610_vm7, %v603_v32 }
 0x279   : > { %v684_v35 = vpop.f32.mrf.mxu1 }
 0x27a   : > { %v685_v36 = vadd.f32 %v684_v35, %v608_v34 }
 0x27b   : > { %v820_v37 = vpop.f32.mrf.mxu1 }
 0x27c   : > { %v688_v38 = vadd.f32 %v685_v36, %v1050_v5 }
 0x27e   : > { %v695_v40 = vmul.f32 %v693_v39, %v688_v38 }
 0x280   : > { %696 = vst [vmem:[%s323_s27] sm:$0xff] %v695_v40 }
 0x281   : > { %880 = shalt.err (!%p877_p3)
}
 0x282   : > { %s881_s25 = scalar_lea.hbm %s709_s16, 128  ;;  %s885_s27 = scalar_lea.hbm %s1123_s9, 512 }
 0x283   : > { %p882_p4 = scmp.ne.s32.totalorder %s709_s16, %s881_s25  ;;  %p886_p9 = scmp.lt.s32.totalorder %s709_s16, %s1123_s9 }
 0x284   : > { %p887_p10 = scmp.lt.s32.totalorder %s885_s27, %s881_s25 }
 0x285   : > { %p883_p7 = pnand %p882_p4, %p1021_p5 }
 0x286   : > { %p888_p11 = por %p887_p10, %p886_p9 }
 0x287   : > { %p884_p8 = pneg %p883_p7 }
 0x289   : > { %p889_p12 = pnand %p888_p11, %p884_p8 }
 0x28b   : > { %892 = shalt.err (!%p889_p12)
}
 0x28c   : > { %821 = dma.vmem_to_hbm [thread:$0]  (%p1021_p5), %s712_s28, 128, %s709_s16, %s698_s17  }
 0x28d PF: > { %p827_p13 = scmp.ge.s32.totalorder %s927_s12, 2  ;;  %s723_s21 = sand.u32 1, %s915_s30  }
 0x28e   : > { %s724_s22 = scalar_lea.sflag [#allocation3], %s723_s21 }
 0x28f   : > { %p824_p0 = pnand %p827_p13, %p1025_p6 }
 0x291   : > { %p825_p1 = pneg %p824_p0 }
 0x293   : > { %910 = dma.done.wait (%p825_p1), %s724_s22, 128  }
 0x294   : > { %912 = vsyncadd (%p825_p1), %s724_s22, 4294967168  ;;  %p19_p2 = scmp.ge.s32.totalorder %s1008_s15, 6   ;;  %s1126_s30 = smov %s919_s10 }
 0x295   : > { %s1127_s10 = smov %s923_s11  ;;  %s1128_s11 = smov %s1019_s18 }
 0x296   : > { %s1129_s12 = smov %s1008_s15  ;;  %21 = sbr.rel (!%p19_p2) target bundleno = 3 (0x3), region = 91 }
 0x29b   :  { %729 = vsyncpa [#allocation3], 1 }
 0x29c   :  { %731 = vsyncpa [#allocation3 + $0x1], 1 }

</bundles_post_ra>
